<compile_context>
chip_gen: v6e
topology: v6e:2x2x1
jax: 0.10.0
libtpu: 0.0.40
codegen_flags: <defaults>
</compile_context>

<pallas_src>
import functools

import jax
import jax.numpy as jnp
from jax.experimental import pallas as pl
from jax.experimental.pallas import tpu as pltpu


def _tcn_kernel(*refs, layer_meta, L):
    """Fused TemporalConvNet forward for one batch-tile.

    Activation layout: (C, tile_B * L), column j = b*L + t (time fastest, lanes).

    refs = [x_ref, (w_tap_0 .. w_tap_{K-1}, b_aug) per layer ..., o_ref]
      x_ref   : (C0, tile_lanes)   bf16 input activations
      w_tap_k : (rows, C_in)       bf16; rows = 2*C_out on downsample layers
                (bottom half holds the 1x1 downsample weight, only in the s=0
                tap), else rows = C_out.
      b_aug   : (rows, 1)          f32 conv bias (+ downsample bias stacked)
      o_ref   : (C_last, tile_lanes) f32 output
    """
    x_ref, o_ref = refs[0], refs[-1]
    param_refs = refs[1:-1]

    lanes = x_ref.shape[1]
    # Time index within each batch element (Chomp1d causal mask), built
    # in-kernel: one iota + modulo instead of an extra HBM->VMEM DMA.
    t_local = jax.lax.broadcasted_iota(jnp.int32, (1, lanes), 1) % L

    h = x_ref[...]                         # bf16 activations carried layer->layer
    hf = h.astype(jnp.float32)             # f32 view of the current layer input

    r = 0
    for (c_in, c_out, ksize, dil, has_down) in layer_meta:
        tap_refs = param_refs[r:r + ksize]
        b_ref = param_refs[r + ksize]
        r += ksize + 1

        rows = 2 * c_out if has_down else c_out
        acc = jnp.zeros((rows, lanes), jnp.float32)

        # Dilated causal conv (+ fused 1x1 downsample) as K small MXU matmuls
        # accumulated in f32 -- no stacked-tap VMEM scratch round-trip.
        for k in range(ksize):
            s = (ksize - 1 - k) * dil      # static causal left-shift of tap k
            if s >= L:                     # tap looks entirely before t = 0
                continue
            if s == 0:
                xs = h
            else:
                # roll wraps across batch elements; the t >= s mask (applied
                # AFTER the roll) zeroes exactly those wrapped positions.
                xs = jnp.where(t_local >= s, jnp.roll(h, s, axis=1),
                               jnp.zeros_like(h))
            acc = acc + jnp.dot(tap_refs[k][...], xs,
                                preferred_element_type=jnp.float32)
        acc = acc + b_ref[...]

        if has_down:
            conv = acc[:c_out]             # conv1 + chomp + bias
            res = acc[c_out:]              # 1x1 downsample(h) + bias (fused rows)
        else:
            conv = acc
            res = hf                       # identity residual (C_in == C_out)

        # relu1 -> (+ residual) -> relu2 ; dropout is identity at inference.
        # TODO(synk): training-mode nn.Dropout(p=0.2) is not implemented.
        hf = jnp.maximum(jnp.maximum(conv, 0.0) + res, 0.0)
        h = hf.astype(jnp.bfloat16)        # bf16 storage / MXU format next layer

    o_ref[...] = hf.astype(o_ref.dtype)


def _pick_tile_b(B, L, max_tile_lanes=4096):
    """Pick a batch-tile size.

    Returns the full batch (single grid step, full-extent blocks, so no (8,128)
    divisibility constraint) when it is small enough; otherwise the largest
    divisor of B whose lane width (tile_B * L) is a multiple of 128 and fits
    the lane budget, so output stores stay unmasked and tiles double-buffer.
    """
    if B * L <= max_tile_lanes:
        return B
    for tb in range(B - 1, 0, -1):
        if B % tb == 0 and (tb * L) % 128 == 0 and tb * L <= max_tile_lanes:
            return tb
    return B


def temporal_conv_net(x, params):
    """x: (B, C0, L) f32 -> (B, C_last, L) f32. Whole network in one pallas_call."""
    B, c0, L = x.shape
    BL = B * L
    tile_b = _pick_tile_b(B, L)
    num_tiles = B // tile_b
    tile_lanes = tile_b * L

    # Lane-dense (C, B*L) layout, time fastest; bf16 at the kernel boundary.
    x_flat = jnp.transpose(x, (1, 0, 2)).reshape(c0, BL).astype(jnp.bfloat16)

    args = [x_flat]
    in_specs = [pl.BlockSpec((c0, tile_lanes), lambda i: (0, i))]
    layer_meta = []
    c_in = c0
    flops = 0
    for p in params:
        w_eff = p["w_eff"]                           # (c_out, c_in, K), weight_norm folded
        c_out, _, ksize = w_eff.shape
        dil = p["dilation"]
        has_down = p["wd"] is not None
        if not has_down:
            assert c_in == c_out, "identity residual requires C_in == C_out"
        rows = 2 * c_out if has_down else c_out

        for k in range(ksize):
            wt = jnp.zeros((rows, c_in), jnp.float32)
            wt = wt.at[:c_out, :].set(w_eff[:, :, k])
            if has_down and k == ksize - 1:          # s=0 tap carries the 1x1 downsample
                wt = wt.at[c_out:, :].set(p["wd"])
            args.append(wt.astype(jnp.bfloat16))
            in_specs.append(pl.BlockSpec((rows, c_in), lambda i: (0, 0)))
        b_aug = p["b"] if not has_down else jnp.concatenate([p["b"], p["bd"]], axis=0)
        args.append(b_aug.astype(jnp.float32))
        in_specs.append(pl.BlockSpec((rows, 1), lambda i: (0, 0)))

        layer_meta.append((c_in, c_out, ksize, dil, has_down))
        flops += 2 * c_out * ksize * c_in * BL + (2 * c_out * c_in * BL if has_down else 0)
        c_in = c_out
    c_last = c_in

    kernel = functools.partial(_tcn_kernel, layer_meta=tuple(layer_meta), L=L)

    # Advisory cost so XLA schedules surrounding ops sensibly.
    w_bytes = sum(int(a.size) * int(a.dtype.itemsize) for a in args[1:])
    bytes_accessed = int(x_flat.size) * 2 + w_bytes + c_last * BL * 4
    cost = pl.CostEstimate(flops=int(flops), transcendentals=0,
                           bytes_accessed=int(bytes_accessed))

    # Rough per-tile VMEM working set (double-buffered I/O tiles + resident
    # weights + live activations).  Only raise the scoped limit when the
    # default (16/32 MiB) would be exceeded; cap at 64 MiB (fits v7x).
    max_cout = max(m[1] for m in layer_meta)
    vmem_need = (2 * tile_lanes * (c0 * 2 + c_last * 4)
                 + 2 * w_bytes
                 + tile_lanes * 4 * (c0 + 4 * max_cout))
    vmem_limit = None if vmem_need < 24 * 2**20 else int(min(2 * vmem_need, 64 * 2**20))

    out_flat = pl.pallas_call(
        kernel,
        grid=(num_tiles,),
        in_specs=in_specs,
        out_specs=pl.BlockSpec((c_last, tile_lanes), lambda i: (0, i)),
        out_shape=jax.ShapeDtypeStruct((c_last, BL), jnp.float32),
        compiler_params=pltpu.CompilerParams(
            dimension_semantics=("parallel",),
            vmem_limit_bytes=vmem_limit,
        ),
        cost_estimate=cost,
    )(*args)

    return jnp.transpose(out_flat.reshape(c_last, B, L), (1, 0, 2))


def init_tcn_params(key, num_inputs, num_channels, kernel_size=2):
    """Deterministic synthetic parameters mirroring the PyTorch module shapes.

    weight_norm(Conv1d): w_eff = g * v / ||v|| (norm over (in, k) per out-channel).
    """
    params = []
    in_ch = num_inputs
    for i, out_ch in enumerate(num_channels):
        dilation = 2 ** i
        k1, k2, k3, k4, k5 = jax.random.split(jax.random.fold_in(key, i), 5)

        v = jax.random.normal(k1, (out_ch, in_ch, kernel_size), jnp.float32) * 0.3
        g = 1.0 + 0.1 * jax.random.normal(k2, (out_ch,), jnp.float32)
        v_norm = jnp.sqrt(jnp.sum(v * v, axis=(1, 2), keepdims=True))
        w_eff = g[:, None, None] * v / v_norm              # (C_out, C_in, K)
        bias = 0.1 * jax.random.normal(k3, (out_ch, 1), jnp.float32)

        p = {"w_eff": w_eff, "b": bias, "dilation": dilation, "ksize": kernel_size,
             "wd": None, "bd": None}
        if in_ch != out_ch:
            p["wd"] = jax.random.normal(k4, (out_ch, in_ch), jnp.float32) * 0.3
            p["bd"] = 0.1 * jax.random.normal(k5, (out_ch, 1), jnp.float32)
        params.append(p)
        in_ch = out_ch
    return params


def tcn_reference(x, params):
    """Pure-JAX f32 reference matching the PyTorch module forward."""
    h = x
    for p in params:
        w = p["w_eff"]
        ksize = w.shape[-1]
        dil = p["dilation"]
        pad = (ksize - 1) * dil
        conv = jax.lax.conv_general_dilated(
            h, w, window_strides=(1,), padding=[(pad, 0)],
            rhs_dilation=(dil,), dimension_numbers=("NCH", "OIH", "NCH"))
        conv = conv + p["b"][None, :, :]
        out = jax.nn.relu(conv)
        if p["wd"] is None:
            res = h
        else:
            res = jnp.einsum("oi,bil->bol", p["wd"], h) + p["bd"][None, :, :]
        h = jax.nn.relu(out + res)
    return h


if __name__ == "__main__":
    key = jax.random.PRNGKey(0)
    kx, kp = jax.random.split(key)

    # Small shapes consistent with the module: x is (B, num_inputs, L).
    B, num_inputs, L = 2, 4, 16
    num_channels = [8, 8, 16]
    kernel_size = 2

    x = jax.random.normal(kx, (B, num_inputs, L), jnp.float32)
    params = init_tcn_params(kp, num_inputs, num_channels, kernel_size)

    y = temporal_conv_net(x, params)
    jax.block_until_ready(y)
    assert y.shape == (B, num_channels[-1], L)

    ref = tcn_reference(x, params)
    rel_err = float(jnp.max(jnp.abs(y - ref)) / (jnp.max(jnp.abs(ref)) + 1e-6))
    assert rel_err < 5e-2, f"mismatch vs f32 reference: rel_err={rel_err}"

    print("KERNEL_OK")
</pallas_src>

<mosaic_0001>
module attributes {stable_mosaic.version = 11 : i64} {
  func.func @_tcn_kernel(%arg0: i32, %arg1: memref<4x32xbf16, #tpu.memory_space<vmem>>, %arg2: memref<16x4xbf16, #tpu.memory_space<vmem>>, %arg3: memref<16x4xbf16, #tpu.memory_space<vmem>>, %arg4: memref<16x1xf32, #tpu.memory_space<vmem>>, %arg5: memref<8x8xbf16, #tpu.memory_space<vmem>>, %arg6: memref<8x8xbf16, #tpu.memory_space<vmem>>, %arg7: memref<8x1xf32, #tpu.memory_space<vmem>>, %arg8: memref<32x8xbf16, #tpu.memory_space<vmem>>, %arg9: memref<32x8xbf16, #tpu.memory_space<vmem>>, %arg10: memref<32x1xf32, #tpu.memory_space<vmem>>, %arg11: memref<16x32xf32, #tpu.memory_space<vmem>>) attributes {dimension_semantics = [#tpu.dimension_semantics<parallel>], iteration_bounds = array<i64: 1>, scalar_prefetch = 0 : i64, scratch_operands = 0 : i64, tpu.core_type = #tpu.core_type<tc>, window_params = [{transform_indices = @transform_0, window_bounds = array<i64: 4, 32>}, {pipeline_mode = #tpu.pipeline_mode<synchronous>, transform_indices = @transform_1, window_bounds = array<i64: 16, 4>}, {pipeline_mode = #tpu.pipeline_mode<synchronous>, transform_indices = @transform_2, window_bounds = array<i64: 16, 4>}, {pipeline_mode = #tpu.pipeline_mode<synchronous>, transform_indices = @transform_3, window_bounds = array<i64: 16, 1>}, {pipeline_mode = #tpu.pipeline_mode<synchronous>, transform_indices = @transform_4, window_bounds = array<i64: 8, 8>}, {pipeline_mode = #tpu.pipeline_mode<synchronous>, transform_indices = @transform_5, window_bounds = array<i64: 8, 8>}, {pipeline_mode = #tpu.pipeline_mode<synchronous>, transform_indices = @transform_6, window_bounds = array<i64: 8, 1>}, {pipeline_mode = #tpu.pipeline_mode<synchronous>, transform_indices = @transform_7, window_bounds = array<i64: 32, 8>}, {pipeline_mode = #tpu.pipeline_mode<synchronous>, transform_indices = @transform_8, window_bounds = array<i64: 32, 8>}, {pipeline_mode = #tpu.pipeline_mode<synchronous>, transform_indices = @transform_9, window_bounds = array<i64: 32, 1>}, {transform_indices = @transform_10, window_bounds = array<i64: 16, 32>}]} {
    %0 = tpu.iota {dimensions = array<i32: 1>} : vector<1x32xi32>
    %c16_i32 = arith.constant 16 : i32
    %c0_i32 = arith.constant 0 : i32
    %1 = arith.cmpi eq, %c16_i32, %c0_i32 : i32
    %c1_i32 = arith.constant 1 : i32
    %2 = arith.select %1, %c1_i32, %c16_i32 : i32
    %3 = vector.broadcast %2 : i32 to vector<1x32xi32>
    %4 = arith.remsi %0, %3 : vector<1x32xi32>
    %c0_i32_0 = arith.constant 0 : i32
    %5 = vector.broadcast %c0_i32_0 : i32 to vector<1x32xi32>
    %6 = arith.cmpi ne, %4, %5 : vector<1x32xi32>
    %c0_i32_1 = arith.constant 0 : i32
    %7 = vector.broadcast %c0_i32_1 : i32 to vector<1x32xi32>
    %8 = arith.cmpi slt, %4, %7 : vector<1x32xi32>
    %c0_i32_2 = arith.constant 0 : i32
    %9 = arith.cmpi slt, %2, %c0_i32_2 : i32
    %10 = vector.broadcast %9 : i1 to vector<1x32xi1>
    %11 = vector.broadcast %10 : vector<1x32xi1> to vector<1x32xi1>
    %12 = arith.xori %8, %11 : vector<1x32xi1>
    %13 = arith.andi %12, %6 : vector<1x32xi1>
    %14 = vector.broadcast %2 : i32 to vector<1x32xi32>
    %15 = arith.addi %4, %14 : vector<1x32xi32>
    %16 = arith.select %13, %15, %4 : vector<1x32xi1>, vector<1x32xi32>
    %c0 = arith.constant 0 : index
    %c0_3 = arith.constant 0 : index
    %17 = vector.load %arg1[%c0, %c0_3] : memref<4x32xbf16, #tpu.memory_space<vmem>>, vector<4x32xbf16>
    %cst = arith.constant 0.000000e+00 : f32
    %18 = vector.broadcast %cst : f32 to vector<16x32xf32>
    %c1_i32_4 = arith.constant 1 : i32
    %19 = vector.broadcast %c1_i32_4 : i32 to vector<1x32xi32>
    %20 = arith.cmpi sge, %16, %19 : vector<1x32xi32>
    %21 = vector.extract_strided_slice %17 {offsets = [0, 31], sizes = [4, 1], strides = [1, 1]} : vector<4x32xbf16> to vector<4x1xbf16>
    %22 = vector.extract_strided_slice %17 {offsets = [0, 0], sizes = [4, 31], strides = [1, 1]} : vector<4x32xbf16> to vector<4x31xbf16>
    %23 = tpu.concatenate %21, %22 in 1 : vector<4x1xbf16>, vector<4x31xbf16> -> vector<4x32xbf16>
    %cst_5 = arith.constant 0.000000e+00 : bf16
    %24 = vector.broadcast %cst_5 : bf16 to vector<4x32xbf16>
    %25 = vector.shape_cast %20 : vector<1x32xi1> to vector<1x32xi1>
    %26 = vector.broadcast %25 : vector<1x32xi1> to vector<4x32xi1>
    %27 = arith.select %26, %23, %24 : vector<4x32xi1>, vector<4x32xbf16>
    %c0_6 = arith.constant 0 : index
    %c0_7 = arith.constant 0 : index
    %28 = vector.load %arg2[%c0_6, %c0_7] : memref<16x4xbf16, #tpu.memory_space<vmem>>, vector<16x4xbf16>
    %cst_8 = arith.constant dense<0.000000e+00> : vector<16x32xf32>
    %29 = tpu.matmul %28, %27, %cst_8 {dimension_numbers = #tpu.dot_dimension_numbers<[1], [0], [0], [1], [0, 0, 1, 1], [], []>} : vector<16x4xbf16>, vector<4x32xbf16>, vector<16x32xf32> -> vector<16x32xf32>
    %30 = arith.addf %18, %29 : vector<16x32xf32>
    %c0_9 = arith.constant 0 : index
    %c0_10 = arith.constant 0 : index
    %31 = vector.load %arg3[%c0_9, %c0_10] : memref<16x4xbf16, #tpu.memory_space<vmem>>, vector<16x4xbf16>
    %cst_11 = arith.constant dense<0.000000e+00> : vector<16x32xf32>
    %32 = tpu.matmul %31, %17, %cst_11 {dimension_numbers = #tpu.dot_dimension_numbers<[1], [0], [0], [1], [0, 0, 1, 1], [], []>} : vector<16x4xbf16>, vector<4x32xbf16>, vector<16x32xf32> -> vector<16x32xf32>
    %33 = arith.addf %30, %32 : vector<16x32xf32>
    %c0_12 = arith.constant 0 : index
    %c0_13 = arith.constant 0 : index
    %34 = vector.load %arg4[%c0_12, %c0_13] : memref<16x1xf32, #tpu.memory_space<vmem>>, vector<16x1xf32>
    %35 = vector.broadcast %34 : vector<16x1xf32> to vector<16x32xf32>
    %36 = arith.addf %33, %35 : vector<16x32xf32>
    %37 = vector.extract_strided_slice %36 {offsets = [0, 0], sizes = [8, 32], strides = [1, 1]} : vector<16x32xf32> to vector<8x32xf32>
    %38 = vector.extract_strided_slice %36 {offsets = [8, 0], sizes = [8, 32], strides = [1, 1]} : vector<16x32xf32> to vector<8x32xf32>
    %cst_14 = arith.constant 0.000000e+00 : f32
    %39 = vector.broadcast %cst_14 : f32 to vector<8x32xf32>
    %40 = arith.maximumf %37, %39 : vector<8x32xf32>
    %41 = arith.addf %40, %38 : vector<8x32xf32>
    %cst_15 = arith.constant 0.000000e+00 : f32
    %42 = vector.broadcast %cst_15 : f32 to vector<8x32xf32>
    %43 = arith.maximumf %41, %42 : vector<8x32xf32>
    %44 = arith.truncf %43 : vector<8x32xf32> to vector<8x32xbf16>
    %cst_16 = arith.constant 0.000000e+00 : f32
    %45 = vector.broadcast %cst_16 : f32 to vector<8x32xf32>
    %c2_i32 = arith.constant 2 : i32
    %46 = vector.broadcast %c2_i32 : i32 to vector<1x32xi32>
    %47 = arith.cmpi sge, %16, %46 : vector<1x32xi32>
    %48 = vector.extract_strided_slice %44 {offsets = [0, 30], sizes = [8, 2], strides = [1, 1]} : vector<8x32xbf16> to vector<8x2xbf16>
    %49 = vector.extract_strided_slice %44 {offsets = [0, 0], sizes = [8, 30], strides = [1, 1]} : vector<8x32xbf16> to vector<8x30xbf16>
    %50 = tpu.concatenate %48, %49 in 1 : vector<8x2xbf16>, vector<8x30xbf16> -> vector<8x32xbf16>
    %cst_17 = arith.constant 0.000000e+00 : bf16
    %51 = vector.broadcast %cst_17 : bf16 to vector<8x32xbf16>
    %52 = vector.shape_cast %47 : vector<1x32xi1> to vector<1x32xi1>
    %53 = vector.broadcast %52 : vector<1x32xi1> to vector<8x32xi1>
    %54 = arith.select %53, %50, %51 : vector<8x32xi1>, vector<8x32xbf16>
    %c0_18 = arith.constant 0 : index
    %c0_19 = arith.constant 0 : index
    %55 = vector.load %arg5[%c0_18, %c0_19] : memref<8x8xbf16, #tpu.memory_space<vmem>>, vector<8x8xbf16>
    %cst_20 = arith.constant dense<0.000000e+00> : vector<8x32xf32>
    %56 = tpu.matmul %55, %54, %cst_20 {dimension_numbers = #tpu.dot_dimension_numbers<[1], [0], [0], [1], [0, 0, 1, 1], [], []>} : vector<8x8xbf16>, vector<8x32xbf16>, vector<8x32xf32> -> vector<8x32xf32>
    %57 = arith.addf %45, %56 : vector<8x32xf32>
    %c0_21 = arith.constant 0 : index
    %c0_22 = arith.constant 0 : index
    %58 = vector.load %arg6[%c0_21, %c0_22] : memref<8x8xbf16, #tpu.memory_space<vmem>>, vector<8x8xbf16>
    %cst_23 = arith.constant dense<0.000000e+00> : vector<8x32xf32>
    %59 = tpu.matmul %58, %44, %cst_23 {dimension_numbers = #tpu.dot_dimension_numbers<[1], [0], [0], [1], [0, 0, 1, 1], [], []>} : vector<8x8xbf16>, vector<8x32xbf16>, vector<8x32xf32> -> vector<8x32xf32>
    %60 = arith.addf %57, %59 : vector<8x32xf32>
    %c0_24 = arith.constant 0 : index
    %c0_25 = arith.constant 0 : index
    %61 = vector.load %arg7[%c0_24, %c0_25] : memref<8x1xf32, #tpu.memory_space<vmem>>, vector<8x1xf32>
    %62 = vector.broadcast %61 : vector<8x1xf32> to vector<8x32xf32>
    %63 = arith.addf %60, %62 : vector<8x32xf32>
    %cst_26 = arith.constant 0.000000e+00 : f32
    %64 = vector.broadcast %cst_26 : f32 to vector<8x32xf32>
    %65 = arith.maximumf %63, %64 : vector<8x32xf32>
    %66 = arith.addf %65, %43 : vector<8x32xf32>
    %cst_27 = arith.constant 0.000000e+00 : f32
    %67 = vector.broadcast %cst_27 : f32 to vector<8x32xf32>
    %68 = arith.maximumf %66, %67 : vector<8x32xf32>
    %69 = arith.truncf %68 : vector<8x32xf32> to vector<8x32xbf16>
    %cst_28 = arith.constant 0.000000e+00 : f32
    %70 = vector.broadcast %cst_28 : f32 to vector<32x32xf32>
    %c4_i32 = arith.constant 4 : i32
    %71 = vector.broadcast %c4_i32 : i32 to vector<1x32xi32>
    %72 = arith.cmpi sge, %16, %71 : vector<1x32xi32>
    %73 = vector.extract_strided_slice %69 {offsets = [0, 28], sizes = [8, 4], strides = [1, 1]} : vector<8x32xbf16> to vector<8x4xbf16>
    %74 = vector.extract_strided_slice %69 {offsets = [0, 0], sizes = [8, 28], strides = [1, 1]} : vector<8x32xbf16> to vector<8x28xbf16>
    %75 = tpu.concatenate %73, %74 in 1 : vector<8x4xbf16>, vector<8x28xbf16> -> vector<8x32xbf16>
    %cst_29 = arith.constant 0.000000e+00 : bf16
    %76 = vector.broadcast %cst_29 : bf16 to vector<8x32xbf16>
    %77 = vector.shape_cast %72 : vector<1x32xi1> to vector<1x32xi1>
    %78 = vector.broadcast %77 : vector<1x32xi1> to vector<8x32xi1>
    %79 = arith.select %78, %75, %76 : vector<8x32xi1>, vector<8x32xbf16>
    %c0_30 = arith.constant 0 : index
    %c0_31 = arith.constant 0 : index
    %80 = vector.load %arg8[%c0_30, %c0_31] : memref<32x8xbf16, #tpu.memory_space<vmem>>, vector<32x8xbf16>
    %cst_32 = arith.constant dense<0.000000e+00> : vector<32x32xf32>
    %81 = tpu.matmul %80, %79, %cst_32 {dimension_numbers = #tpu.dot_dimension_numbers<[1], [0], [0], [1], [0, 0, 1, 1], [], []>} : vector<32x8xbf16>, vector<8x32xbf16>, vector<32x32xf32> -> vector<32x32xf32>
    %82 = arith.addf %70, %81 : vector<32x32xf32>
    %c0_33 = arith.constant 0 : index
    %c0_34 = arith.constant 0 : index
    %83 = vector.load %arg9[%c0_33, %c0_34] : memref<32x8xbf16, #tpu.memory_space<vmem>>, vector<32x8xbf16>
    %cst_35 = arith.constant dense<0.000000e+00> : vector<32x32xf32>
    %84 = tpu.matmul %83, %69, %cst_35 {dimension_numbers = #tpu.dot_dimension_numbers<[1], [0], [0], [1], [0, 0, 1, 1], [], []>} : vector<32x8xbf16>, vector<8x32xbf16>, vector<32x32xf32> -> vector<32x32xf32>
    %85 = arith.addf %82, %84 : vector<32x32xf32>
    %c0_36 = arith.constant 0 : index
    %c0_37 = arith.constant 0 : index
    %86 = vector.load %arg10[%c0_36, %c0_37] : memref<32x1xf32, #tpu.memory_space<vmem>>, vector<32x1xf32>
    %87 = vector.broadcast %86 : vector<32x1xf32> to vector<32x32xf32>
    %88 = arith.addf %85, %87 : vector<32x32xf32>
    %89 = vector.extract_strided_slice %88 {offsets = [0, 0], sizes = [16, 32], strides = [1, 1]} : vector<32x32xf32> to vector<16x32xf32>
    %90 = vector.extract_strided_slice %88 {offsets = [16, 0], sizes = [16, 32], strides = [1, 1]} : vector<32x32xf32> to vector<16x32xf32>
    %cst_38 = arith.constant 0.000000e+00 : f32
    %91 = vector.broadcast %cst_38 : f32 to vector<16x32xf32>
    %92 = arith.maximumf %89, %91 : vector<16x32xf32>
    %93 = arith.addf %92, %90 : vector<16x32xf32>
    %cst_39 = arith.constant 0.000000e+00 : f32
    %94 = vector.broadcast %cst_39 : f32 to vector<16x32xf32>
    %95 = arith.maximumf %93, %94 : vector<16x32xf32>
    %c0_40 = arith.constant 0 : index
    %c0_41 = arith.constant 0 : index
    %96 = vector.load %arg11[%c0_40, %c0_41] : memref<16x32xf32, #tpu.memory_space<vmem>>, vector<16x32xf32>
    tpu.vector_store %arg11[%c0_40, %c0_41], %95 {strides = array<i32>} : memref<16x32xf32, #tpu.memory_space<vmem>>, vector<16x32xf32>,
    return
  }
  func.func @transform_0(%arg0: i32) -> (i32, i32) {
    %c0_i32 = arith.constant 0 : i32
    %c0_i32_0 = arith.constant 0 : i32
    return %c0_i32, %arg0 : i32, i32
  }
  func.func @transform_1(%arg0: i32) -> (i32, i32) {
    %c0_i32 = arith.constant 0 : i32
    %c0_i32_0 = arith.constant 0 : i32
    %c0_i32_1 = arith.constant 0 : i32
    return %c0_i32, %c0_i32_0 : i32, i32
  }
  func.func @transform_2(%arg0: i32) -> (i32, i32) {
    %c0_i32 = arith.constant 0 : i32
    %c0_i32_0 = arith.constant 0 : i32
    %c0_i32_1 = arith.constant 0 : i32
    return %c0_i32, %c0_i32_0 : i32, i32
  }
  func.func @transform_3(%arg0: i32) -> (i32, i32) {
    %c0_i32 = arith.constant 0 : i32
    %c0_i32_0 = arith.constant 0 : i32
    %c0_i32_1 = arith.constant 0 : i32
    return %c0_i32, %c0_i32_0 : i32, i32
  }
  func.func @transform_4(%arg0: i32) -> (i32, i32) {
    %c0_i32 = arith.constant 0 : i32
    %c0_i32_0 = arith.constant 0 : i32
    %c0_i32_1 = arith.constant 0 : i32
    return %c0_i32, %c0_i32_0 : i32, i32
  }
  func.func @transform_5(%arg0: i32) -> (i32, i32) {
    %c0_i32 = arith.constant 0 : i32
    %c0_i32_0 = arith.constant 0 : i32
    %c0_i32_1 = arith.constant 0 : i32
    return %c0_i32, %c0_i32_0 : i32, i32
  }
  func.func @transform_6(%arg0: i32) -> (i32, i32) {
    %c0_i32 = arith.constant 0 : i32
    %c0_i32_0 = arith.constant 0 : i32
    %c0_i32_1 = arith.constant 0 : i32
    return %c0_i32, %c0_i32_0 : i32, i32
  }
  func.func @transform_7(%arg0: i32) -> (i32, i32) {
    %c0_i32 = arith.constant 0 : i32
    %c0_i32_0 = arith.constant 0 : i32
    %c0_i32_1 = arith.constant 0 : i32
    return %c0_i32, %c0_i32_0 : i32, i32
  }
  func.func @transform_8(%arg0: i32) -> (i32, i32) {
    %c0_i32 = arith.constant 0 : i32
    %c0_i32_0 = arith.constant 0 : i32
    %c0_i32_1 = arith.constant 0 : i32
    return %c0_i32, %c0_i32_0 : i32, i32
  }
  func.func @transform_9(%arg0: i32) -> (i32, i32) {
    %c0_i32 = arith.constant 0 : i32
    %c0_i32_0 = arith.constant 0 : i32
    %c0_i32_1 = arith.constant 0 : i32
    return %c0_i32, %c0_i32_0 : i32, i32
  }
  func.func @transform_10(%arg0: i32) -> (i32, i32) {
    %c0_i32 = arith.constant 0 : i32
    %c0_i32_0 = arith.constant 0 : i32
    return %c0_i32, %arg0 : i32, i32
  }
}

</mosaic_0001>

<bundles_post_ra>
// kernel: tpu_custom_call.1
= control target key start
LH: loop header
LB: loop body
LE: loop exit
PB: predicated region body
PF: predicated region fallthrough
CT: control target
= control target key end

     0   :  { %v37_v0 = vlaneseq  ;;  %v644_v2 = vmov 1983009808   ;;  %vm87_vm0 = vcmask 1041408   ;;  %v645_v5 = vmov 0.0   ;;  %s789_s0 = inlined_call_operand.vmem [shape: bf16[4,32], index: 0, kind: input, shape index: {}]   ;;  %s790_s1 = inlined_call_operand.vmem [shape: bf16[16,4], index: 1, kind: input, shape index: {}]   ;;  %s791_s2 = inlined_call_operand.vmem [shape: bf16[16,4], index: 2, kind: input, shape index: {}]   ;;  %s792_s3 = inlined_call_operand.vmem [shape: f32[16,1], index: 3, kind: input, shape index: {}]   ;;  %s793_s4 = inlined_call_operand.vmem [shape: bf16[8,8], index: 4, kind: input, shape index: {}]   ;;  %s794_s5 = inlined_call_operand.vmem [shape: bf16[8,8], index: 5, kind: input, shape index: {}]   ;;  %s795_s6 = inlined_call_operand.vmem [shape: f32[8,1], index: 6, kind: input, shape index: {}]   ;;  %s796_s7 = inlined_call_operand.vmem [shape: bf16[32,8], index: 7, kind: input, shape index: {}]   ;;  %s797_s8 = inlined_call_operand.vmem [shape: bf16[32,8], index: 8, kind: input, shape index: {}]   ;;  %s798_s9 = inlined_call_operand.vmem [shape: f32[32,1], index: 9, kind: input, shape index: {}]   ;;  %s799_s10 = inlined_call_operand.hbm [shape: f32[16,32], index: 10, kind: output, shape index: {}]  }
   0x1   :  { %v51_v1 = vld [vmem:[%s789_s0] sm:$0x3]  ;;  %v55_v3 = vunpack.c.l.s4 %v644_v2  ;;  %563 = vmatprep.subr.bf16.mxu0 %v645_v5  ;;  %vm646_vm1 = vmmov 0   ;;  %vm83_vm2 = vcmask 31744   ;;  %569 = vmatprep.subr.bf16.mxu1 %v645_v5  ;;  %v647_v12 = vmov 0   ;;  %v185_v13 = vld [vmem:[%s792_s3 + $0x8] sm:$0xff] }
   0x2   :  { %v58_v4 = vshrl.u32 %v37_v0, 7  ;;  %v89_v6 = vsel %vm87_vm0, %v51_v1, 0  ;;  %565 = vmatprep.mubr.msk.bf16.mxu0 %vm646_vm1, %v645_v5  ;;  %v616_v7 = vld [vmem:[%s791_s2] sm:$0xff]   ;;  %571 = vmatprep.mubr.msk.bf16.mxu1 %vm646_vm1, %v645_v5  ;;  %s648_s2 = smov 97  }
   0x3   :  { %v56_v8 = vunpack.c.0.s8 %v55_v3  ;;  %564 = vmatpush3.bf16.msra.mxu0 %v89_v6  ;;  %v184_v10 = vld [vmem:[%s792_s3] sm:$0xff]  ;;  %614 = vset.pattern.permute.xlu1 %v647_v12 }
   0x4   :  { %575 = vmatprep.subr.bf16.mxu0 %v645_v5  ;;  %188 = vperm.xlu1 %614, %v184_v10  }
   0x5   :  { %v59_v9 = vsub.s32 %v56_v8, %v58_v4  ;;  %615 = vset.pattern.permute.xlu0 %v647_v12 }
   0x6   :  { %566 = vmatmul.mubr.msk.bf16.vlgmr.msra.gmra.mxu0 %vm83_vm2, %v616_v7 }
   0x7   :  { %v60_v11 = vrot.slane %v51_v1, %v59_v9  ;;  %577 = vmatprep.mubr.msk.bf16.mxu0 %vm646_vm1, %v645_v5 }
   0x9   :  { %61 = vrot.lane.b32.xlu0 %v60_v11, %s648_s2 }
   0xa   :  { %15 = vsyncpa [#allocation3], 0  ;;  %193 = vperm.xlu1 %614, %v185_v13   ;;  %s649_s20 = smov 1   ;;  %v38_v14 = vand.u32 127, %v37_v0  ;;  %vm65_vm4 = vcmask 7168   ;;  %v617_v21 = vld [vmem:[%s790_s1] sm:$0xff]  }
   0xb   :  { %vm223_vm6 = vcmask 1043456   ;;  %s650_s1 = smov 2   ;;  %s651_s3 = smov 98   ;;  %v218_v41 = vld [vmem:[%s794_s5] sm:$0xf]  ;;  %vm219_vm7 = vcmask 64512  }
   0xc   :  { %v729_v15 = vand.u32 15, %v38_v14  ;;  %v313_v42 = vld [vmem:[%s795_s6] sm:$0xff]  ;;  %v484_v44 = vld [vmem:[%s798_s9 + $0x10] sm:$0xff]  ;;  %vm208_vm9 = vcmask 15360   ;;  %s652_s14 = smov 100   ;;  %s653_s0 = smov 4  }
   0xd   :  { %63 = vrot.lane.b32.xlu0 %v60_v11, %s649_s20  ;;  %v482_v43 = vld [vmem:[%s798_s9] sm:$0xff]  ;;  %v483_v6 = vld [vmem:[%s798_s9 + $0x8] sm:$0xff]  ;;  %v485_v7 = vld [vmem:[%s798_s9 + $0x18] sm:$0xff]  ;;  %vm516_vm13 = vcmask 261120  }
   0xe   :  { %vm52_vm3 = vcmp.ge.s32.totalorder %v729_v15, 1  ;;  %vm202_vm8 = vcmp.ge.s32.totalorder %v729_v15, 2  ;;  %v217_v50 = vld [vmem:[%s793_s4] sm:$0xf]  ;;  %vm324_vm11 = vcmp.ge.s32.totalorder %v729_v15, 4  ;;  %v621_v13 = vld [vmem:[%s796_s7 + $0x8] sm:$0xff]  }
   0xf   :  { %vm72_vm5 = vmpackc.low %vm52_vm3, %vm52_vm3  ;;  %v618_v57 = vld [vmem:[%s797_s8] sm:$0xff]  }
  0x10   :  { %vm215_vm10 = vmpackc.low %vm202_vm8, %vm202_vm8  ;;  %v620_v1 = vld [vmem:[%s796_s7] sm:$0xff]   ;;  %s654_s7 = smov [#allocation2]  }
  0x11   :  { %vm336_vm12 = vmpackc.low %vm324_vm11, %vm324_vm11  ;;  %s524_s9 = sshll.u32 %s654_s7, 4  ;;  %s525_s9 = int_to_ptr.vmem [resolvable:$true] %s524_s9 }
  0x12   :  { %s622_s21 = scalar_lea.vmem %s525_s9, 256  ;;  %p627_p1 = scmp.lt.s32.totalorder %s525_s9, %s525_s9 }
  0x13   :  { %p623_p0 = scmp.ne.s32.totalorder %s525_s9, %s622_s21  ;;  %p628_p2 = scmp.lt.s32.totalorder %s622_s21, %s622_s21 }
  0x15   :  { %p629_p3 = por %p628_p2, %p627_p1 }
  0x17   :  { %p630_p4 = pnand %p629_p3, %p623_p0 }
  0x7b   :  { %v62_v16 = vpop.permute.xlu0 %61 }
  0x7f   :  { %v64_v17 = vpop.permute.xlu0 %63  ;;  %v189_v26 = vpop.permute.xlu1 %188 }
  0x80   :  { %v68_v18 = vsel %vm65_vm4, %v62_v16, %v64_v17 }
  0x81   :  { %v73_v19 = vsel %vm72_vm5, %v68_v18, 0 }
  0x82   :  { %v141_v20 = vsel %vm87_vm0, %v73_v19, 0 }
  0x83   :  { %570 = vmatpush3.bf16.msra.mxu1 %v141_v20 }
  0x84   :  { %581 = vmatprep.subr.bf16.mxu1 %v645_v5 }
  0x85   :  { %v194_v33 = vpop.permute.xlu1 %193 }
  0x86   :  { %572 = vmatmul.mubr.msk.bf16.vlgmr.msra.gmra.mxu1 %vm83_vm2, %v617_v21 }
  0x87   :  { %583 = vmatprep.mubr.msk.bf16.mxu1 %vm646_vm1, %v645_v5  ;;  %v619_v5 = vld [vmem:[%s797_s8 + $0x8] sm:$0xff]  }
  0xc6   :  { %v125_v22 = vpop.f32.mrf.mxu0 }
  0xc8   :  { %v567_v23 = vpop.f32.mrf.mxu0 }
  0xca   :  { %v128_v24 = vpop.f32.mrf.mxu0 }
  0xcc   :  { %v568_v25 = vpop.f32.mrf.mxu0 }
 0x146   :  { %v177_v27 = vpop.f32.mrf.mxu1 }
 0x147   :  { %v178_v28 = vadd.f32 %v177_v27, %v125_v22 }
 0x148   :  { %v573_v29 = vpop.f32.mrf.mxu1 }
 0x149   :  { %v196_v30 = vadd.f32 %v189_v26, %v178_v28 }
 0x14a   :  { %v180_v31 = vpop.f32.mrf.mxu1 }
 0x14b   :  { %v181_v32 = vadd.f32 %v180_v31, %v128_v24  ;;  %v198_v35 = vmax.f32 %v196_v30, 0.0 }
 0x14c   :  { %v574_v34 = vpop.f32.mrf.mxu1 }
 0x14d   :  { %v197_v36 = vadd.f32 %v194_v33, %v181_v32 }
 0x14f   :  { %v199_v37 = vadd.f32 %v198_v35, %v197_v36 }
 0x151   :  { %v200_v38 = vmax.f32 %v199_v37, 0.0 }
 0x153   :  { %v201_v39 = vpack.c.bf16 %v200_v38, %v200_v38 }
 0x155   :  { %206 = vrot.lane.b32.xlu1 %v201_v39, %s650_s1  ;;  %204 = vrot.lane.b32.xlu0 %v201_v39, %s651_s3  ;;  %v225_v40 = vsel %vm223_vm6, %v201_v39, 0 }
 0x156   :  { %576 = vmatpush3.bf16.msra.mxu0 %v225_v40 }
 0x159   :  { %578 = vmatmul.mubr.msk.bf16.vlgmr.msra.gmra.mxu0 %vm219_vm7, %v218_v41  ;;  %316 = vperm.xlu0 %615, %v313_v42  }
 0x15a   :  { %589 = vmatprep.mubr.msk.bf16.mxu0 %vm219_vm7, %v618_v57 }
 0x15d   :  { %488 = vperm.xlu0 %615, %v482_v43  }
 0x161   :  { %498 = vperm.xlu0 %615, %v484_v44  }
 0x1c7   :  { %v207_v45 = vpop.permute.xlu1 %206  ;;  %v205_v46 = vpop.permute.xlu0 %204 }
 0x1c8   :  { %v211_v47 = vsel %vm208_vm9, %v205_v46, %v207_v45 }
 0x1c9   :  { %v216_v48 = vsel %vm215_vm10, %v211_v47, 0 }
 0x1ca   :  { %v271_v49 = vsel %vm223_vm6, %v216_v48, 0 }
 0x1cb   :  { %582 = vmatpush3.bf16.msra.mxu1 %v271_v49 }
 0x1ce   :  { %584 = vmatmul.mubr.msk.bf16.vlgmr.msra.gmra.mxu1 %vm219_vm7, %v217_v50 }
 0x1cf   :  { %595 = vmatprep.mubr.msk.bf16.mxu1 %vm219_vm7, %v620_v1 }
 0x1d4   :  { %v317_v58 = vpop.permute.xlu0 %316 }
 0x1d8   :  { %v489_v17 = vpop.permute.xlu0 %488 }
 0x1dc   :  { %v499_v24 = vpop.permute.xlu0 %498 }
 0x219   :  { %v261_v51 = vpop.f32.mrf.mxu0 }
 0x21b   :  { %v579_v52 = vpop.f32.mrf.mxu0 }
 0x21d   :  { %v264_v53 = vpop.f32.mrf.mxu0 }
 0x21f   :  { %v580_v54 = vpop.f32.mrf.mxu0 }
 0x28e   :  { %v307_v55 = vpop.f32.mrf.mxu1 }
 0x28f   :  { %v308_v56 = vadd.f32 %v307_v55, %v261_v51 }
 0x290   :  { %v585_v59 = vpop.f32.mrf.mxu1 }
 0x291   :  { %v319_v60 = vadd.f32 %v317_v58, %v308_v56 }
 0x292   :  { %v310_v61 = vpop.f32.mrf.mxu1 }
 0x293   :  { %v320_v62 = vmax.f32 %v319_v60, 0.0 }
 0x294   :  { %v586_v63 = vpop.f32.mrf.mxu1 }
 0x295   :  { %v321_v0 = vadd.f32 %v320_v62, %v200_v38 }
 0x297   :  { %v322_v2 = vmax.f32 %v321_v0, 0.0 }
 0x299   :  { %v323_v3 = vpack.c.bf16 %v322_v2, %v322_v2 }
 0x29b   :  { %326 = vrot.lane.b32.xlu1 %v323_v3, %s652_s14  ;;  %599 = vmatprep.subr.msk.bf16.mxu0 %vm223_vm6, %v323_v3  ;;  %v363_v4 = vsel %vm223_vm6, %v323_v3, 0 }
 0x29c   :  { %588 = vmatpush3.bf16.msra.mxu0 %v363_v4 }
 0x29f   :  { %328 = vrot.lane.b32.xlu1 %v323_v3, %s653_s0  ;;  %590 = vmatmul.mubr.msk.bf16.vlgmr.msra.gmra.mxu0 %vm219_vm7, %v619_v5 }
 0x2a3   :  { %493 = vperm.xlu1 %614, %v483_v6  }
 0x2a7   :  { %503 = vperm.xlu1 %614, %v485_v7  }
 0x30d   :  { %v327_v8 = vpop.permute.xlu1 %326 }
 0x311   :  { %v329_v9 = vpop.permute.xlu1 %328 }
 0x312   :  { %v332_v10 = vsel %vm83_vm2, %v327_v8, %v329_v9 }
 0x313   :  { %v337_v11 = vsel %vm336_vm12, %v332_v10, 0 }
 0x314   :  { %600 = vmatprep.subr.msk.bf16.mxu1 %vm223_vm6, %v337_v11  ;;  %v431_v12 = vsel %vm223_vm6, %v337_v11, 0 }
 0x315   :  { %594 = vmatpush3.bf16.msra.mxu1 %v431_v12 }
 0x318   :  { %596 = vmatmul.mubr.msk.bf16.vlgmr.msra.gmra.mxu1 %vm219_vm7, %v621_v13 }
 0x31e   :  { %v494_v22 = vpop.permute.xlu1 %493 }
 0x322   :  { %v504_v34 = vpop.permute.xlu1 %503 }
 0x35f   :  { %v591_v14 = vpop.f32.mrf.mxu0 }
 0x361   :  { %v399_v16 = vpop.f32.mrf.mxu0 }
 0x363   :  { %v592_v19 = vpop.f32.mrf.mxu0 }
 0x365   :  { %v402_v26 = vpop.f32.mrf.mxu0 }
 0x3d8   :  { %v597_v15 = vpop.f32.mrf.mxu1 }
 0x3d9   :  { %v476_v20 = vadd.f32 %v597_v15, %v591_v14 }
 0x3da   :  { %v467_v18 = vpop.f32.mrf.mxu1 }
 0x3db   :  { %v468_v21 = vadd.f32 %v467_v18, %v399_v16  ;;  %v508_v28 = vadd.f32 %v499_v24, %v476_v20 }
 0x3dc   :  { %v598_v23 = vpop.f32.mrf.mxu1 }
 0x3dd   :  { %v506_v25 = vadd.f32 %v489_v17, %v468_v21  ;;  %v479_v30 = vadd.f32 %v598_v23, %v592_v19 }
 0x3de   :  { %v470_v27 = vpop.f32.mrf.mxu1 }
 0x3df   :  { %v510_v29 = vmax.f32 %v506_v25, 0.0  ;;  %v471_v31 = vadd.f32 %v470_v27, %v402_v26  ;;  %v509_v36 = vadd.f32 %v504_v34, %v479_v30 }
 0x3e1   :  { %v512_v32 = vadd.f32 %v510_v29, %v508_v28  ;;  %v507_v33 = vadd.f32 %v494_v22, %v471_v31 }
 0x3e3   :  { %v514_v35 = vmax.f32 %v512_v32, 0.0  ;;  %v511_v37 = vmax.f32 %v507_v33, 0.0 }
 0x3e5   :  { %517 = vst.msk [vmem:[#allocation2] sm:$0xff] %vm516_vm13, %v514_v35  ;;  %v513_v38 = vadd.f32 %v511_v37, %v509_v36 }
 0x3e7   :  { %v515_v39 = vmax.f32 %v513_v38, 0.0 }
 0x3e9   :  { %518 = vst.msk [vmem:[#allocation2 + $0x8] sm:$0xff] %vm516_vm13, %v515_v39 }
 0x3ea   :  { %633 = shalt.err (!%p630_p4)
}
 0x3eb   :  { %s655_s22 = smov 128   ;;  %s656_s1 = smov 8  }
 0x3ec   :  { %530 = dma.vmem_to_hbm [thread:$0]  %s525_s9, 256, %s799_s10, [#allocation3], %s655_s22, %s655_s22, %s656_s1  }
 0x3ed   :  { %642 = dma.done.wait [#allocation3], 256  }
 0x3ee   :  { %643 = vsyncadd [#allocation3], 4294967040 }
 0x3ef   :  { %534 = vsyncpa [#allocation3], 1 }

</bundles_post_ra>
